<compile_context>
chip_gen: v7x
topology: tpu7x:2x2x1
jax: 0.10.0
libtpu: 0.0.40
codegen_flags: <defaults>
</compile_context>

<pallas_src>
import functools

import numpy as np
import jax
import jax.numpy as jnp
from jax import lax
from jax.experimental import pallas as pl
from jax.experimental.pallas import tpu as pltpu

LRELU_SLOPE = 0.1
VMEM_LIMIT = 48 * 1024 * 1024        # fits v7x (64 MiB physical); plenty on v5e/v6e
_MAX_CONV_ROWS = 24                  # max output rows per conv grid step


def _round_up(x, m):
    return (x + m - 1) // m * m


# ---------------------------------------------------------------------------
# STFT magnitude front-end
# ---------------------------------------------------------------------------
def _hann_window_padded(fft_size, win_length):
    """Periodic Hann window (torch.hann_window default), zero-padded to n_fft."""
    n = np.arange(win_length, dtype=np.float64)
    win = 0.5 - 0.5 * np.cos(2.0 * np.pi * n / win_length)
    lpad = (fft_size - win_length) // 2
    return np.pad(win, (lpad, fft_size - win_length - lpad))


def _interleaved_dft_basis(fft_size, win_length, tn):
    """Windowed real-DFT basis, [cos blk | sin blk] interleaved per TN freq tile.

    Shape (fft_size, 2 * NF_pad): one MXU dot per frequency tile yields both
    the real and imaginary parts.
    """
    n_freq = fft_size // 2 + 1
    nf_pad = _round_up(n_freq, tn)
    nb = nf_pad // tn
    win = _hann_window_padded(fft_size, win_length)
    n = np.arange(fft_size)[:, None]
    k = np.arange(n_freq)[None, :]
    ang = 2.0 * np.pi * ((n * k) % fft_size) / fft_size        # mod keeps args small
    cos_m = np.zeros((fft_size, nf_pad), np.float32)
    sin_m = np.zeros((fft_size, nf_pad), np.float32)
    cos_m[:, :n_freq] = (win[:, None] * np.cos(ang)).astype(np.float32)
    sin_m[:, :n_freq] = (win[:, None] * np.sin(ang)).astype(np.float32)
    basis = np.zeros((fft_size, nb, 2, tn), np.float32)
    basis[:, :, 0, :] = cos_m.reshape(fft_size, nb, tn)
    basis[:, :, 1, :] = sin_m.reshape(fft_size, nb, tn)
    return basis.reshape(fft_size, 2 * nf_pad), n_freq, nf_pad


def _frame_signal(x, fft_size, hop):
    """torch.stft(center=True) framing: reflect pad by n_fft//2, frame every hop."""
    B, T = x.shape
    half = fft_size // 2
    xp = jnp.pad(x, ((0, 0), (half, half)), mode="reflect")
    n_frames = 1 + T // hop
    idx = (jnp.arange(n_frames) * hop)[:, None] + jnp.arange(fft_size)[None, :]
    return xp[:, idx]                                           # (B, n_frames, fft_size)


def _stft_mag_kernel(f_ref, b_ref, o_ref, *, tn):
    prod = jnp.dot(f_ref[...], b_ref[...], preferred_element_type=jnp.float32)
    re = prod[:, :tn]
    im = prod[:, tn:]
    o_ref[...] = jnp.sqrt(jnp.maximum(re * re + im * im, 1e-7)).astype(o_ref.dtype)


def stft_magnitude_pallas(x, fft_size, hop, win_length, *, tn=128, tm_max=512):
    """|STFT| magnitude spectrogram, output (B, n_frames, n_freq) bfloat16."""
    B, T = x.shape
    frames = _frame_signal(x, fft_size, hop)
    n_frames = frames.shape[1]
    M = B * n_frames
    fmat = frames.reshape(M, fft_size).astype(jnp.bfloat16)

    basis_np, n_freq, nf_pad = _interleaved_dft_basis(fft_size, win_length, tn)
    basis = jnp.asarray(basis_np, jnp.bfloat16)

    TM = min(tm_max, _round_up(M, 8))
    M_pad = _round_up(M, TM)
    fmat = jnp.pad(fmat, ((0, M_pad - M), (0, 0)))

    out = pl.pallas_call(
        functools.partial(_stft_mag_kernel, tn=tn),
        out_shape=jax.ShapeDtypeStruct((M_pad, nf_pad), jnp.bfloat16),
        grid=(M_pad // TM, nf_pad // tn),
        in_specs=[
            # frames: resident across the frequency-tile axis (constant block idx)
            pl.BlockSpec((TM, fft_size), lambda i, j: (i, 0)),
            # cos|sin basis tile for frequency block j
            pl.BlockSpec((fft_size, 2 * tn), lambda i, j: (0, j)),
        ],
        out_specs=pl.BlockSpec((TM, tn), lambda i, j: (i, j)),
        compiler_params=pltpu.CompilerParams(
            dimension_semantics=("parallel", "parallel"),
            vmem_limit_bytes=VMEM_LIMIT),
    )(fmat, basis)

    return out[:M, :n_freq].reshape(B, n_frames, n_freq)


# ---------------------------------------------------------------------------
# Conv2d (kh=3) + bias + optional leaky relu, row-blocked, merged-K taps
# ---------------------------------------------------------------------------
def _conv_block_kernel(x_ref, w_ref, b_ref, o_ref, *,
                       kh, kw, stride_w, w_out, cin, rows, apply_lrelu):
    # x_ref: (1, Hp, Wq, S*Cin) bf16 -- whole padded, phase-folded image (resident)
    # w_ref: (kh, kw*Cin, Cout) bf16 (resident), b_ref: (1, Cout) f32
    # o_ref: (1, rows, W_out, Cout) f32
    base = pl.program_id(1) * rows
    cout = o_ref.shape[-1]
    bias = b_ref[...]                                           # (1, Cout) f32

    def row_body(i, carry):
        acc = jnp.zeros((w_out, cout), jnp.float32)             # local (vreg) accumulator
        for dh in range(kh):                                    # kh == 3, unrolled
            row = x_ref[0, base + i + dh]                       # (Wq, S*Cin) bf16
            w_dh = w_ref[dh]                                    # (kw*Cin, Cout) bf16
            if cin == 1:
                # First layer: K would be <= kw; VPU broadcast-MACs are cheaper.
                for dw in range(kw):
                    q0 = dw // stride_w
                    c0 = dw % stride_w
                    tap = row[q0:q0 + w_out, c0:c0 + 1].astype(jnp.float32)
                    acc = acc + tap * w_dh[dw:dw + 1, :].astype(jnp.float32)
            else:
                taps = []
                for dw in range(kw):
                    q0 = dw // stride_w
                    c0 = (dw % stride_w) * cin
                    taps.append(row[q0:q0 + w_out, c0:c0 + cin])
                lhs = jnp.concatenate(taps, axis=-1)            # (W_out, kw*Cin)
                acc = acc + jnp.dot(lhs, w_dh, preferred_element_type=jnp.float32)
        res = acc + bias
        if apply_lrelu:
            res = jnp.where(res >= 0.0, res, res * LRELU_SLOPE)
        o_ref[0, i] = res.astype(o_ref.dtype)                   # single write per row
        return carry

    lax.fori_loop(0, rows, row_body, 0)


def conv2d_pallas(x_nhwc, w_oihw, bias, stride_w, pad_h, pad_w, apply_lrelu):
    """Conv2d with kernel (3, kw), stride (1, stride_w), padding (pad_h, pad_w)."""
    B, H, W, Cin = x_nhwc.shape
    Cout, Cin_w, kh, kw = w_oihw.shape
    assert Cin == Cin_w and kh == 3 and pad_h == 1
    S = stride_w

    Cout_real = Cout
    if Cout < 8:                        # pad tiny Cout (the final 1-channel conv)
        w_oihw = jnp.pad(w_oihw, ((0, 8 - Cout), (0, 0), (0, 0), (0, 0)))
        bias = jnp.pad(bias, (0, 8 - Cout))
        Cout = 8

    Wp = W + 2 * pad_w
    H_out = H                           # kh=3, pad_h=1, stride_h=1
    W_out = (Wp - kw) // S + 1

    # Row blocking: a few large grid steps per image instead of one per row.
    n_rb = -(-H_out // _MAX_CONV_ROWS)
    R = -(-H_out // n_rb)
    H_pad = n_rb * R

    # Conv zero padding + extra zero rows for row blocking, then fold the width
    # axis into (Wq, S*Cin) so stride-S taps are contiguous static slices.
    Wp_s = _round_up(Wp, S)
    xb = jnp.pad(x_nhwc.astype(jnp.bfloat16),
                 ((0, 0),
                  (pad_h, pad_h + (H_pad - H_out)),
                  (pad_w, Wp_s - W - pad_w),
                  (0, 0)))
    Hp = H_pad + 2 * pad_h
    Wq = Wp_s // S
    xf = xb.reshape(B, Hp, Wq, S * Cin)

    # Weights as (kh, kw*Cin, Cout), K ordered (dw, cin) to match the tap concat.
    wt = jnp.transpose(w_oihw, (2, 3, 1, 0)).reshape(kh, kw * Cin, Cout).astype(jnp.bfloat16)
    bb = bias.reshape(1, Cout).astype(jnp.float32)

    kernel = functools.partial(_conv_block_kernel, kh=kh, kw=kw, stride_w=S,
                               w_out=W_out, cin=Cin, rows=R, apply_lrelu=apply_lrelu)

    out = pl.pallas_call(
        kernel,
        out_shape=jax.ShapeDtypeStruct((B, H_pad, W_out, Cout), jnp.float32),
        grid=(B, n_rb),
        in_specs=[
            # whole padded image per batch item, resident across the row-block axis
            pl.BlockSpec((1, Hp, Wq, S * Cin), lambda b, r: (b, 0, 0, 0)),
            pl.BlockSpec((kh, kw * Cin, Cout), lambda b, r: (0, 0, 0)),
            pl.BlockSpec((1, Cout), lambda b, r: (0, 0)),
        ],
        out_specs=pl.BlockSpec((1, R, W_out, Cout), lambda b, r: (b, r, 0, 0)),
        compiler_params=pltpu.CompilerParams(
            dimension_semantics=("parallel", "parallel"),
            vmem_limit_bytes=VMEM_LIMIT),
    )(xf, wt, bb)

    out = out[:, :H_out]
    if Cout_real != Cout:
        out = out[..., :Cout_real]
    return out


# ---------------------------------------------------------------------------
# Parameters (deterministic synthetic init; weight_norm == raw weight at init)
# ---------------------------------------------------------------------------
_SPEC_D_CFG = [
    # (cin, cout, kh, kw, stride_w, pad_h, pad_w, lrelu)
    (1, 32, 3, 9, 1, 1, 4, True),
    (32, 32, 3, 9, 2, 1, 4, True),
    (32, 32, 3, 9, 2, 1, 4, True),
    (32, 32, 3, 9, 2, 1, 4, True),
    (32, 32, 3, 3, 1, 1, 1, True),
    (32, 1, 3, 3, 1, 1, 1, False),      # self.out (no leaky relu)
]


def init_spec_d_params(key):
    params = []
    for (cin, cout, kh, kw, sw, ph, pw, lrelu) in _SPEC_D_CFG:
        key, k_w, k_b = jax.random.split(key, 3)
        fan_in = cin * kh * kw
        w = jax.random.normal(k_w, (cout, cin, kh, kw), jnp.float32) * (2.0 / fan_in) ** 0.5
        b = jax.random.normal(k_b, (cout,), jnp.float32) * 0.01
        params.append(dict(w=w, b=b, stride_w=sw, pad_h=ph, pad_w=pw, lrelu=lrelu))
    return params, key


# ---------------------------------------------------------------------------
# Forward passes (Pallas-backed)
# ---------------------------------------------------------------------------
def spec_discriminator_forward(params, y, fft_size, hop, win_length):
    x = y[:, 0, :]                                              # y.squeeze(1)
    spec = stft_magnitude_pallas(x, fft_size, hop, win_length)  # bf16
    h = spec[..., None]                                         # NHWC (B, frames, freq, 1)
    fmap_nhwc = []
    for p in params:
        h = conv2d_pallas(h, p["w"], p["b"], p["stride_w"], p["pad_h"], p["pad_w"],
                          p["lrelu"])
        fmap_nhwc.append(h)
    out = h.reshape(h.shape[0], -1)                             # torch.flatten(y, 1, -1)
    # NCHW only for API parity; done once, outside the compute chain.
    fmap = [jnp.transpose(f, (0, 3, 1, 2)) for f in fmap_nhwc]
    return out, fmap


def multi_res_spec_discriminator_forward(all_params, y, fft_sizes, hop_sizes, win_lengths):
    y_d_rs, fmap_rs = [], []
    for params, fft, hop, win in zip(all_params, fft_sizes, hop_sizes, win_lengths):
        o, f = spec_discriminator_forward(params, y, fft, hop, win)
        y_d_rs.append(o)
        fmap_rs.append(f)
    return y_d_rs, fmap_rs


# ---------------------------------------------------------------------------
# Pure-JAX reference (jnp.fft + lax.conv) for verification
# ---------------------------------------------------------------------------
def _reference_stft_mag(x, fft_size, hop, win_length):
    frames = _frame_signal(x, fft_size, hop)
    win = jnp.asarray(_hann_window_padded(fft_size, win_length), jnp.float32)
    X = jnp.fft.rfft(frames * win[None, None, :], axis=-1)
    power = jnp.real(X) ** 2 + jnp.imag(X) ** 2
    return jnp.sqrt(jnp.maximum(power, 1e-7))


def _reference_spec_forward(params, y, fft_size, hop, win_length):
    x = y[:, 0, :]
    spec = _reference_stft_mag(x, fft_size, hop, win_length)
    h = spec[:, None, :, :]                                     # NCHW
    fmap = []
    for p in params:
        h = jax.lax.conv_general_dilated(
            h, p["w"], window_strides=(1, p["stride_w"]),
            padding=((p["pad_h"], p["pad_h"]), (p["pad_w"], p["pad_w"])),
            dimension_numbers=("NCHW", "OIHW", "NCHW"))
        h = h + p["b"].reshape(1, -1, 1, 1)
        if p["lrelu"]:
            h = jnp.where(h >= 0.0, h, h * LRELU_SLOPE)
        fmap.append(h)
    return h.reshape(h.shape[0], -1), fmap


def reference_forward(all_params, y, fft_sizes, hop_sizes, win_lengths):
    outs, fmaps = [], []
    for params, fft, hop, win in zip(all_params, fft_sizes, hop_sizes, win_lengths):
        o, f = _reference_spec_forward(params, y, fft, hop, win)
        outs.append(o)
        fmaps.append(f)
    return outs, fmaps


def _rel_err(a, b):
    a = jnp.asarray(a, jnp.float32).ravel()
    b = jnp.asarray(b, jnp.float32).ravel()
    return float(jnp.linalg.norm(a - b) / (jnp.linalg.norm(b) + 1e-6))


if __name__ == "__main__":
    key = jax.random.PRNGKey(0)
    key, kx = jax.random.split(key)

    B, T = 2, 2048                    # small audio clip; enough for all three STFTs
    y = jax.random.normal(kx, (B, 1, T), dtype=jnp.float32)

    fft_sizes = [1024, 2048, 512]
    hop_sizes = [120, 240, 50]
    win_lengths = [600, 1200, 240]

    all_params = []
    for _ in range(3):                # one parameter set per SpecDiscriminator
        params, key = init_spec_d_params(key)
        all_params.append(params)

    y_d_rs, fmap_rs = multi_res_spec_discriminator_forward(
        all_params, y, fft_sizes, hop_sizes, win_lengths)
    jax.block_until_ready((y_d_rs, fmap_rs))

    ref_y, ref_f = reference_forward(all_params, y, fft_sizes, hop_sizes, win_lengths)

    ok = True
    for a, r in zip(y_d_rs, ref_y):
        ok = ok and (a.shape == r.shape) and (_rel_err(a, r) < 5e-2)
    for fa, fr in zip(fmap_rs, ref_f):
        for a, r in zip(fa, fr):
            ok = ok and (a.shape == r.shape) and (_rel_err(a, r) < 5e-2)

    if ok:
        print("KERNEL_OK")
    else:
        raise SystemExit("Pallas output mismatch vs pure-JAX reference")
</pallas_src>

<mosaic_0001>
module attributes {stable_mosaic.version = 11 : i64} {
  func.func @_stft_mag_kernel(%arg0: i32, %arg1: i32, %arg2: memref<40x1024xbf16, #tpu.memory_space<vmem>>, %arg3: memref<1024x256xbf16, #tpu.memory_space<vmem>>, %arg4: memref<40x128xbf16, #tpu.memory_space<vmem>>) attributes {dimension_semantics = [#tpu.dimension_semantics<parallel>, #tpu.dimension_semantics<parallel>], iteration_bounds = array<i64: 1, 5>, scalar_prefetch = 0 : i64, scratch_operands = 0 : i64, tpu.core_type = #tpu.core_type<tc>, window_params = [{transform_indices = @transform_0, window_bounds = array<i64: 40, 1024>}, {transform_indices = @transform_1, window_bounds = array<i64: 1024, 256>}, {transform_indices = @transform_2, window_bounds = array<i64: 40, 128>}]} {
    %c0 = arith.constant 0 : index
    %c0_0 = arith.constant 0 : index
    %0 = vector.load %arg2[%c0, %c0_0] : memref<40x1024xbf16, #tpu.memory_space<vmem>>, vector<40x1024xbf16>
    %c0_1 = arith.constant 0 : index
    %c0_2 = arith.constant 0 : index
    %1 = vector.load %arg3[%c0_1, %c0_2] : memref<1024x256xbf16, #tpu.memory_space<vmem>>, vector<1024x256xbf16>
    %cst = arith.constant dense<0.000000e+00> : vector<40x256xf32>
    %2 = tpu.matmul %0, %1, %cst {dimension_numbers = #tpu.dot_dimension_numbers<[1], [0], [0], [1], [0, 0, 1, 1], [], []>} : vector<40x1024xbf16>, vector<1024x256xbf16>, vector<40x256xf32> -> vector<40x256xf32>
    %3 = vector.extract_strided_slice %2 {offsets = [0, 0], sizes = [40, 128], strides = [1, 1]} : vector<40x256xf32> to vector<40x128xf32>
    %4 = vector.extract_strided_slice %2 {offsets = [0, 128], sizes = [40, 128], strides = [1, 1]} : vector<40x256xf32> to vector<40x128xf32>
    %5 = arith.mulf %3, %3 : vector<40x128xf32>
    %6 = arith.mulf %4, %4 : vector<40x128xf32>
    %7 = arith.addf %5, %6 : vector<40x128xf32>
    %cst_3 = arith.constant 1.000000e-07 : f32
    %8 = vector.broadcast %cst_3 : f32 to vector<40x128xf32>
    %9 = arith.maximumf %7, %8 : vector<40x128xf32>
    %10 = math.sqrt %9 : vector<40x128xf32>
    %11 = arith.truncf %10 : vector<40x128xf32> to vector<40x128xbf16>
    %c0_4 = arith.constant 0 : index
    %c0_5 = arith.constant 0 : index
    %12 = vector.load %arg4[%c0_4, %c0_5] : memref<40x128xbf16, #tpu.memory_space<vmem>>, vector<40x128xbf16>
    tpu.vector_store %arg4[%c0_4, %c0_5], %11 {strides = array<i32>} : memref<40x128xbf16, #tpu.memory_space<vmem>>, vector<40x128xbf16>,
    return
  }
  func.func @transform_0(%arg0: i32, %arg1: i32) -> (i32, i32) {
    %c0_i32 = arith.constant 0 : i32
    %c0_i32_0 = arith.constant 0 : i32
    return %arg0, %c0_i32 : i32, i32
  }
  func.func @transform_1(%arg0: i32, %arg1: i32) -> (i32, i32) {
    %c0_i32 = arith.constant 0 : i32
    %c0_i32_0 = arith.constant 0 : i32
    return %c0_i32, %arg1 : i32, i32
  }
  func.func @transform_2(%arg0: i32, %arg1: i32) -> (i32, i32) {
    %c0_i32 = arith.constant 0 : i32
    return %arg0, %arg1 : i32, i32
  }
}

</mosaic_0001>

<bundles_post_ra>
// kernel: tpu_custom_call.1
= control target key start
LH: loop header
LB: loop body
LE: loop exit
PB: predicated region body
PF: predicated region fallthrough
CT: control target
= control target key end

     0   :  { %7 = vsyncpa [#allocation3], 0  ;;  %s2581_s0 = inlined_call_operand.hbm [shape: bf16[40,1024], index: 0, kind: input, shape index: {}]   ;;  %s2582_s1 = inlined_call_operand.hbm [shape: bf16[1024,1280], index: 1, kind: input, shape index: {}]   ;;  %s2583_s2 = inlined_call_operand.hbm [shape: bf16[40,640], index: 2, kind: output, shape index: {}]  }
   0x1   :  { %8 = vsyncpa [#allocation6], 0 }
   0x2   :  { %10 = vsyncpa [#allocation6 + $0x1], 0 }
   0x3   :  { %11 = vsyncpa [#allocation4], 0 }
   0x4   :  { %13 = vsyncpa [#allocation4 + $0x1], 0  ;;  %s2223_s9 = smov 0   ;;  %s2225_s10 = smov 0  }
   0x5   :  { %s2227_s11 = smov 0   ;;  %s2229_s12 = smov 0  }
   0x6   :  { %s2231_s13 = smov 0   ;;  %s2233_s14 = smov 0  }
   0x7 LB: > { %s1537_s15 = sadd.s32 4294967295, %s2195_s14   ;;  %s1538_s16 = sadd.s32 4294967294, %s2195_s14   ;;  %s2195_s14 = sphi %s2233_s14, %s19_s14   ;;  %s2191_s13 = sphi %s2231_s13, %s2608_s13   ;;  %s2187_s12 = sphi %s2229_s12, %s2607_s12   ;;  %s2183_s11 = sphi %s2227_s11, %s2606_s11   ;;  %s2179_s10 = sphi %s2225_s10, %s2605_s10   ;;  %s2175_s9 = sphi %s2223_s9, %s2604_s9  }
   0x8   : > { %p71_p0 = scmp.ne.s32.totalorder %s2183_s11, %s2179_s10  ;;  %p72_p1 = scmp.eq.s32.totalorder %s2195_s14, 0 }
   0x9   : > { %p77_p2 = scmp.ne.s32.totalorder %s2179_s10, %s2175_s9  ;;  %p2260_p3 = scmp.eq.s32.totalorder %s1537_s15, 0 }
   0xa   : > { %p2264_p4 = por %p72_p1, %p71_p0  ;;  %p103_p5 = scmp.eq.s32.totalorder %s1537_s15, 4 }
   0xb   : > { %s2590_s17 = scalar_select %p2260_p3, 1, 0 }
   0xc   : > { %p2270_p6 = por %p2260_p3, %p77_p2  ;;  %p109_p7 = scmp.eq.s32.totalorder %s1538_s16, 4 }
   0xd   : > { %p2274_p8 = por %p103_p5, %p71_p0  ;;  %p1539_p9 = scmp.ge.s32.totalorder %s2195_s14, 1 }
   0xe   : > { %s2592_s19 = scalar_select %p2270_p6, 1, 0 }
   0xf   : > { %s2593_s20 = scalar_select %p2274_p8, 1, 0 }
  0x10   : > { %p2279_p10 = por %p109_p7, %p77_p2  ;;  %p116_p11 = scmp.lt.s32.totalorder %s2195_s14, 6 }
  0x11   : > { %s2197_s23 = smov [#allocation2]   ;;  %p1781_p0 = scmp.lt.s32.totalorder %s2195_s14, 5 }
  0x12   : > { %s2594_s21 = scalar_select %p2279_p10, 1, 0 }
  0x13   : > { %p2284_p12 = pnand %p1539_p9, %p116_p11  ;;  %s132_s24 = sshll.u32 %s2197_s23, 4  ;;  %s133_s24 = int_to_ptr.vmem [resolvable:$true] %s132_s24 }
  0x14   : > { %p2299_p2 = pnand %p1781_p0, %p2264_p4  ;;  %s28_s27 = sadd.s32 1, %s2191_s13 }
  0x15   : > { %s2595_s22 = scalar_select %p2284_p12, 1, 0 }
  0x16   : > { %p1768_p13 = pneg %p2284_p12  ;;  %s2051_s30 = scalar_lea.hbm %s2581_s0, 2560 }
  0x17   : > { %s2597_s26 = scalar_select %p2299_p2, 1, 0 }
  0x18   : > { %p2293_p1 = pnand %p1768_p13, %p2260_p3  ;;  %p2052_p5 = scmp.ne.s32.totalorder %s2581_s0, %s2051_s30 }
  0x19   : > { %p2058_p4 = scmp.lt.u32.totalorder %s2051_s30, %s2581_s0 }
  0x1a   : > { %p2053_p7 = pneg %p2293_p1 }
  0x1c   : > { %p2054_p9 = pnand %p2053_p7, %p2052_p5 }
  0x1e   : > { %p2055_p11 = pneg %p2054_p9 }
  0x20   : > { %p2060_p13 = pnand %p2058_p4, %p2055_p11 }
  0x22   : > { %2063 = shalt.err (!%p2060_p13)
}
  0x23   : > { %s2064_s7 = scalar_lea.vmem %s133_s24, 2560  ;;  %p2072_p6 = scmp.lt.s32.totalorder %s133_s24, %s133_s24 }
  0x24   : > { %p2065_p0 = scmp.ne.s32.totalorder %s133_s24, %s2064_s7  ;;  %p2073_p3 = scmp.lt.s32.totalorder %s2064_s7, %s2064_s7 }
  0x26   : > { %p2067_p10 = pnand %p2065_p0, %p2053_p7  ;;  %p2074_p12 = por %p2073_p3, %p2072_p6 }
  0x28   : > { %p2068_p8 = pneg %p2067_p10 }
  0x2a   : > { %p2075_p2 = pnand %p2074_p12, %p2068_p8 }
  0x2c   : > { %2078 = shalt.err (!%p2075_p2)
}
  0x2d   : > { %s2198_s8 = smov 512   ;;  %s2199_s15 = smov 32  }
  0x2e   : > { %1771 = dma.hbm_to_vmem [thread:$0]  (!%p2293_p1), %s2581_s0, 2560, %s133_s24, [#allocation3], %s2198_s8, %s2198_s8, %s2199_s15  }
  0x2f   : > { %p29_p5 = scmp.ge.s32.totalorder %s28_s27, 5  ;;  %s64_s23 = sadd.s32 1, %s2183_s11 }
  0x30   : > { %s146_s28 = sand.u32 1, %s2183_s11   ;;  %s1708_s3 = sshll.u32 %s2191_s13, 7 }
  0x31   : > { %s2610_s27 = smov (%p29_p5, %s28_s27), 0  ;;  %s1542_s29 = sshll.u32 %s146_s28, 10 }
  0x32   : > { %s61_s30 = ssub.s32 %s2191_s13, %s2610_s27  ;;  %s2330_s25 = scalar_lea.hbm %s2582_s1, %s1708_s3 }
  0x33   : > { %p62_p3 = scmp.eq.s32.totalorder %s61_s30, 0  ;;  %s150_s24 = scalar_lea.vmem [#allocation5], %s1542_s29 }
  0x34   : > { %s157_s6 = sshll.u32 %s150_s24, 4  ;;  %s2337_s8 = scalar_lea.sflag [#allocation6], %s146_s28  ;;  %s2335_s6 = int_to_ptr.vmem [resolvable:$true] %s157_s6 }
  0x35   : > { %s2333_s7 = scalar_select %p62_p3, %s2183_s11, %s64_s23  }
  0x36   : > { %s2079_s15 = scalar_lea.hbm %s2330_s25, 16384  ;;  %p2598_p8 = scmp.ne.s32.totalorder %s2597_s26, 0 }
  0x37   : > { %p2080_p6 = scmp.ne.s32.totalorder %s2330_s25, %s2079_s15  ;;  %s2084_s30 = scalar_lea.hbm %s2582_s1, 81920 }
  0x38   : > { %p2081_p10 = pneg %p2598_p8  ;;  %p2085_p2 = scmp.lt.u32.totalorder %s2330_s25, %s2582_s1 }
  0x39   : > { %p2086_p7 = scmp.lt.u32.totalorder %s2084_s30, %s2079_s15  ;;  %p2088_p11 = scmp.lt.u32.totalorder %s2079_s15, %s2330_s25 }
  0x3a   : > { %p2082_p12 = pnand %p2081_p10, %p2080_p6 }
  0x3b   : > { %p2087_p9 = por %p2086_p7, %p2085_p2 }
  0x3c   : > { %p2083_p1 = pneg %p2082_p12 }
  0x3d   : > { %p2089_p4 = por %p2088_p11, %p2087_p9 }
  0x3f   : > { %p2090_p13 = pnand %p2089_p4, %p2083_p1 }
  0x41   : > { %2093 = shalt.err (!%p2090_p13)
}
  0x42   : > { %s2094_s23 = scalar_lea.vmem %s2335_s6, 16384  ;;  %s2200_s28 = smov [#allocation5]  }
  0x43   : > { %p2095_p0 = scmp.ne.s32.totalorder %s2335_s6, %s2094_s23  ;;  %s2099_s4 = sshll.u32 %s2200_s28, 4  ;;  %s2100_s4 = int_to_ptr.vmem [resolvable:$false] %s2099_s4 }
  0x44   : > { %s2101_s5 = scalar_lea.vmem %s2100_s4, 32768  ;;  %p2102_p6 = scmp.lt.s32.totalorder %s2335_s6, %s2100_s4 }
  0x45   : > { %p2097_p5 = pnand %p2095_p0, %p2081_p10  ;;  %p2103_p12 = scmp.lt.s32.totalorder %s2101_s5, %s2094_s23 }
  0x47   : > { %p2098_p3 = pneg %p2097_p5  ;;  %p2104_p2 = por %p2103_p12, %p2102_p6 }
  0x49   : > { %p2105_p7 = pnand %p2104_p2, %p2098_p3 }
  0x4b   : > { %2108 = shalt.err (!%p2105_p7)
}
  0x4c   : > { %s2201_s24 = smov 640   ;;  %s2202_s15 = smov 128  }
  0x4d   : > { %s2203_s16 = smov 8   ;;  %p2599_p10 = scmp.ne.s32.totalorder %s2595_s22, 0 }
  0x4e   : > { %1775 = dma.hbm_to_vmem [thread:$0]  (!%p2598_p8), %s2330_s25, 16384, %s2335_s6, %s2337_s8, %s2201_s24, %s2202_s15, %s2203_s16  }
  0x4f   : > { %169 = sbr.rel (%p2599_p10) target bundleno = 491 (0x1eb), region = 28  ;;  %p2600_p1 = scmp.ne.s32.totalorder (!%p2599_p10), %s2590_s17, 0 }
  0x56   : > { %2162 = dma.done.wait (%p2600_p1), [#allocation3], 2560  }
  0x57   : > { %2164 = vsyncadd (%p2600_p1), [#allocation3], 4294964736  ;;  %s2372_s18 = sand.u32 1, %s2179_s10   ;;  %p2601_p8 = scmp.ne.s32.totalorder %s2592_s19, 0 }
  0x58   : > { %s1547_s30 = sshll.u32 %s2372_s18, 10  ;;  %s176_s29 = scalar_lea.sflag [#allocation6], %s2372_s18 }
  0x59   : > { %s2376_s3 = scalar_lea.vmem [#allocation5], %s1547_s30 }
  0x5a   : > { %2166 = dma.done.wait (%p2601_p8), %s176_s29, 16384  }
  0x5b   : > { %2168 = vsyncadd (%p2601_p8), %s176_s29, 4294950912  ;;  %v1841_v0 = vld [vmem:[%s2376_s3 + $0x4] ss:$8 sps:$4 sm:$0xff]   ;;  %v1845_v2 = vld [vmem:[%s2376_s3] ss:$8 sps:$4 sm:$0xff]   ;;  %s1759_s17 = smul.u32 20, %s2372_s18 }
  0x5c   : > { %v1843_v1 = vld [vmem:[%s2376_s3 + $0x204] ss:$8 sps:$4 sm:$0xff]   ;;  %1099 = vmatprep.subr.bf16.mxu1 %v1841_v0  ;;  %v1846_v3 = vld [vmem:[%s2376_s3 + $0x200] ss:$8 sps:$4 sm:$0xff]   ;;  %v1847_v4 = vld [vmem:[%s2376_s3 + $0x14] ss:$8 sps:$4 sm:$0xff]  }
  0x5d   : > { %1221 = vmatprep.subr.bf16.mxu0 %v1843_v1  ;;  %1100 = vmatpush1.bf16.msra.mxu1 %v1845_v2  ;;  %v1849_v5 = vld [vmem:[%s2376_s3 + $0x214] ss:$8 sps:$4 sm:$0xff]   ;;  %v1851_v6 = vld [vmem:[%s2376_s3 + $0x10] ss:$8 sps:$4 sm:$0xff]   ;;  %v1853_v8 = vld [vmem:[%s2376_s3 + $0x24] ss:$8 sps:$4 sm:$0xff]  }
  0x5e   : > { %1222 = vmatpush1.bf16.msra.mxu0 %v1846_v3  ;;  %1101 = vmatprep.subr.bf16.mxu1 %v1847_v4  ;;  %v1852_v7 = vld [vmem:[%s2376_s3 + $0x210] ss:$8 sps:$4 sm:$0xff]   ;;  %v1855_v9 = vld [vmem:[%s2376_s3 + $0x224] ss:$8 sps:$4 sm:$0xff]   ;;  %v1857_v10 = vld [vmem:[%s2376_s3 + $0x20] ss:$8 sps:$4 sm:$0xff]  }
  0x5f   : > { %1223 = vmatprep.subr.bf16.mxu0 %v1849_v5  ;;  %v1858_v11 = vld [vmem:[%s2376_s3 + $0x220] ss:$8 sps:$4 sm:$0xff]   ;;  %v1859_v12 = vld [vmem:[%s2376_s3 + $0x34] ss:$8 sps:$4 sm:$0xff]   ;;  %v1863_v14 = vld [vmem:[%s2376_s3 + $0x30] ss:$8 sps:$4 sm:$0xff]  }
  0x60   : > { %v1861_v13 = vld [vmem:[%s2376_s3 + $0x234] ss:$8 sps:$4 sm:$0xff]   ;;  %v1864_v15 = vld [vmem:[%s2376_s3 + $0x230] ss:$8 sps:$4 sm:$0xff]   ;;  %v1865_v16 = vld [vmem:[%s2376_s3 + $0x44] ss:$8 sps:$4 sm:$0xff]  }
  0x61   : > { %1102 = vmatpush1.bf16.msra.mxu1 %v1851_v6  ;;  %v1867_v17 = vld [vmem:[%s2376_s3 + $0x244] ss:$8 sps:$4 sm:$0xff]   ;;  %v1869_v18 = vld [vmem:[%s2376_s3 + $0x40] ss:$8 sps:$4 sm:$0xff]   ;;  %v1871_v20 = vld [vmem:[%s2376_s3 + $0x54] ss:$8 sps:$4 sm:$0xff]  }
  0x62   : > { %1224 = vmatpush1.bf16.msra.mxu0 %v1852_v7  ;;  %1103 = vmatprep.subr.bf16.mxu1 %v1853_v8  ;;  %v1870_v19 = vld [vmem:[%s2376_s3 + $0x240] ss:$8 sps:$4 sm:$0xff]   ;;  %v1873_v21 = vld [vmem:[%s2376_s3 + $0x254] ss:$8 sps:$4 sm:$0xff]   ;;  %v1875_v22 = vld [vmem:[%s2376_s3 + $0x50] ss:$8 sps:$4 sm:$0xff]  }
  0x63   : > { %1225 = vmatprep.subr.bf16.mxu0 %v1855_v9  ;;  %v1876_v23 = vld [vmem:[%s2376_s3 + $0x250] ss:$8 sps:$4 sm:$0xff]   ;;  %v1877_v24 = vld [vmem:[%s2376_s3 + $0x64] ss:$8 sps:$4 sm:$0xff]   ;;  %v1881_v26 = vld [vmem:[%s2376_s3 + $0x60] ss:$8 sps:$4 sm:$0xff]  }
  0x64   : > { %v1879_v25 = vld [vmem:[%s2376_s3 + $0x264] ss:$8 sps:$4 sm:$0xff]   ;;  %v1882_v27 = vld [vmem:[%s2376_s3 + $0x260] ss:$8 sps:$4 sm:$0xff]   ;;  %v1883_v28 = vld [vmem:[%s2376_s3 + $0x74] ss:$8 sps:$4 sm:$0xff]  }
  0x65   : > { %1104 = vmatpush1.bf16.msra.mxu1 %v1857_v10  ;;  %v1885_v29 = vld [vmem:[%s2376_s3 + $0x274] ss:$8 sps:$4 sm:$0xff]   ;;  %v1887_v30 = vld [vmem:[%s2376_s3 + $0x70] ss:$8 sps:$4 sm:$0xff]   ;;  %v1889_v32 = vld [vmem:[%s2376_s3 + $0x84] ss:$8 sps:$4 sm:$0xff]  }
  0x66   : > { %1226 = vmatpush1.bf16.msra.mxu0 %v1858_v11  ;;  %1105 = vmatprep.subr.bf16.mxu1 %v1859_v12  ;;  %v1888_v31 = vld [vmem:[%s2376_s3 + $0x270] ss:$8 sps:$4 sm:$0xff]   ;;  %v1891_v33 = vld [vmem:[%s2376_s3 + $0x284] ss:$8 sps:$4 sm:$0xff]   ;;  %v1893_v34 = vld [vmem:[%s2376_s3 + $0x80] ss:$8 sps:$4 sm:$0xff]  }
  0x67   : > { %1227 = vmatprep.subr.bf16.mxu0 %v1861_v13  ;;  %v1894_v35 = vld [vmem:[%s2376_s3 + $0x280] ss:$8 sps:$4 sm:$0xff]   ;;  %v1895_v36 = vld [vmem:[%s2376_s3 + $0x94] ss:$8 sps:$4 sm:$0xff]   ;;  %v1899_v38 = vld [vmem:[%s2376_s3 + $0x90] ss:$8 sps:$4 sm:$0xff]  }
  0x68   : > { %v1897_v37 = vld [vmem:[%s2376_s3 + $0x294] ss:$8 sps:$4 sm:$0xff]   ;;  %v1900_v39 = vld [vmem:[%s2376_s3 + $0x290] ss:$8 sps:$4 sm:$0xff]   ;;  %v1901_v40 = vld [vmem:[%s2376_s3 + $0xa4] ss:$8 sps:$4 sm:$0xff]  }
  0x69   : > { %1106 = vmatpush1.bf16.msra.mxu1 %v1863_v14  ;;  %v1903_v41 = vld [vmem:[%s2376_s3 + $0x2a4] ss:$8 sps:$4 sm:$0xff]   ;;  %v1905_v42 = vld [vmem:[%s2376_s3 + $0xa0] ss:$8 sps:$4 sm:$0xff]   ;;  %v1907_v44 = vld [vmem:[%s2376_s3 + $0xb4] ss:$8 sps:$4 sm:$0xff]  }
  0x6a   : > { %1228 = vmatpush1.bf16.msra.mxu0 %v1864_v15  ;;  %1107 = vmatprep.subr.bf16.mxu1 %v1865_v16  ;;  %v1906_v43 = vld [vmem:[%s2376_s3 + $0x2a0] ss:$8 sps:$4 sm:$0xff]   ;;  %v1909_v45 = vld [vmem:[%s2376_s3 + $0x2b4] ss:$8 sps:$4 sm:$0xff]   ;;  %v1911_v46 = vld [vmem:[%s2376_s3 + $0xb0] ss:$8 sps:$4 sm:$0xff]  }
  0x6b   : > { %1229 = vmatprep.subr.bf16.mxu0 %v1867_v17  ;;  %v1912_v47 = vld [vmem:[%s2376_s3 + $0x2b0] ss:$8 sps:$4 sm:$0xff]   ;;  %v203_v48 = vld [vmem:[#allocation2] sm:$0xff]  ;;  %v1919_v58 = vld [vmem:[%s2376_s3 + $0xd4] ss:$8 sps:$4 sm:$0xff]   ;;  %s199_s19 = scalar_lea.vmem [#allocation7], %s1759_s17 }
  0x6c   : > { %v207_v49 = vld [vmem:[#allocation2 + $0x20] sm:$0xff]  ;;  %v205_v53 = vld [vmem:[#allocation2 + $0x10] sm:$0xff]  ;;  %s1705_s22 = sshll.u32 %s2187_s12, 6  ;;  %s1440_s26 = sshll.u32 %s199_s19, 4  ;;  %s2533_s26 = int_to_ptr.vmem [resolvable:$true] %s1440_s26 }
  0x6d   : > { %1108 = vmatpush1.bf16.msra.mxu1 %v1869_v18  ;;  %v1913_v50 = vld [vmem:[%s2376_s3 + $0xc4] ss:$8 sps:$4 sm:$0xff]   ;;  %v1549_v52 = vcombine.high %v203_v48, %v207_v49  ;;  %v209_v54 = vld [vmem:[#allocation2 + $0x30] sm:$0xff]  ;;  %v1917_v56 = vld [vmem:[%s2376_s3 + $0xc0] ss:$8 sps:$4 sm:$0xff]   ;;  %v1548_v8 = vcombine.low %v203_v48, %v207_v49  ;;  %s2531_s8 = scalar_lea.hbm %s2583_s2, %s1705_s22  ;;  %s1425_s12 = scalar_lea.sflag [#allocation4], %s2372_s18 }
  0x6e   : > { %1230 = vmatpush1.bf16.msra.mxu0 %v1870_v19  ;;  %1109 = vmatprep.subr.bf16.mxu1 %v1871_v20  ;;  %v1915_v51 = vld [vmem:[%s2376_s3 + $0x2c4] ss:$8 sps:$4 sm:$0xff]   ;;  %v1553_v55 = vcombine.high %v205_v53, %v209_v54  ;;  %v1918_v57 = vld [vmem:[%s2376_s3 + $0x2c0] ss:$8 sps:$4 sm:$0xff]   ;;  %v1921_v59 = vld [vmem:[%s2376_s3 + $0x2d4] ss:$8 sps:$4 sm:$0xff]   ;;  %v1552_v10 = vcombine.low %v205_v53, %v209_v54 }
  0x6f   : > { %1231 = vmatprep.subr.bf16.mxu0 %v1873_v21  ;;  %1131 = vmatprep.mubr.bf16.mxu1 %v1549_v52  ;;  %v1923_v60 = vld [vmem:[%s2376_s3 + $0xd0] ss:$8 sps:$4 sm:$0xff]   ;;  %v1925_v62 = vld [vmem:[%s2376_s3 + $0xe4] ss:$8 sps:$4 sm:$0xff]   ;;  %v1929_v0 = vld [vmem:[%s2376_s3 + $0xe0] ss:$8 sps:$4 sm:$0xff]  }
  0x70   : > { %1253 = vmatprep.mubr.bf16.mxu0 %v1553_v55  ;;  %v1924_v61 = vld [vmem:[%s2376_s3 + $0x2d0] ss:$8 sps:$4 sm:$0xff]   ;;  %v1927_v63 = vld [vmem:[%s2376_s3 + $0x2e4] ss:$8 sps:$4 sm:$0xff]   ;;  %v1930_v1 = vld [vmem:[%s2376_s3 + $0x2e0] ss:$8 sps:$4 sm:$0xff]  }
  0x71   : > { %1110 = vmatpush1.bf16.msra.mxu1 %v1875_v22  ;;  %v1931_v2 = vld [vmem:[%s2376_s3 + $0xf4] ss:$8 sps:$4 sm:$0xff]   ;;  %v1935_v4 = vld [vmem:[%s2376_s3 + $0xf0] ss:$8 sps:$4 sm:$0xff]   ;;  %v1939_v6 = vld [vmem:[%s2376_s3 + $0x104] ss:$8 sps:$4 sm:$0xff]  }
  0x72   : > { %1232 = vmatpush1.bf16.msra.mxu0 %v1876_v23  ;;  %1111 = vmatprep.subr.bf16.mxu1 %v1877_v24  ;;  %v1933_v3 = vld [vmem:[%s2376_s3 + $0x2f4] ss:$8 sps:$4 sm:$0xff]   ;;  %v1936_v5 = vld [vmem:[%s2376_s3 + $0x2f0] ss:$8 sps:$4 sm:$0xff]   ;;  %v1942_v7 = vld [vmem:[%s2376_s3 + $0x304] ss:$8 sps:$4 sm:$0xff]  }
  0x73   : > { %1233 = vmatprep.subr.bf16.mxu0 %v1879_v25  ;;  %v1937_v9 = vld [vmem:[%s2376_s3 + $0x100] ss:$8 sps:$4 sm:$0xff]   ;;  %v1945_v12 = vld [vmem:[%s2376_s3 + $0x114] ss:$8 sps:$4 sm:$0xff]   ;;  %v1943_v14 = vld [vmem:[%s2376_s3 + $0x110] ss:$8 sps:$4 sm:$0xff]  }
  0x74   : > { %v1940_v11 = vld [vmem:[%s2376_s3 + $0x300] ss:$8 sps:$4 sm:$0xff]   ;;  %v1948_v13 = vld [vmem:[%s2376_s3 + $0x314] ss:$8 sps:$4 sm:$0xff]   ;;  %v1946_v15 = vld [vmem:[%s2376_s3 + $0x310] ss:$8 sps:$4 sm:$0xff]  }
  0x75   : > { %1112 = vmatpush1.bf16.msra.mxu1 %v1881_v26  ;;  %v1951_v16 = vld [vmem:[%s2376_s3 + $0x124] ss:$8 sps:$4 sm:$0xff]   ;;  %v1949_v18 = vld [vmem:[%s2376_s3 + $0x120] ss:$8 sps:$4 sm:$0xff]   ;;  %v1957_v20 = vld [vmem:[%s2376_s3 + $0x134] ss:$8 sps:$4 sm:$0xff]  }
  0x76   : > { %1234 = vmatpush1.bf16.msra.mxu0 %v1882_v27  ;;  %1113 = vmatprep.subr.bf16.mxu1 %v1883_v28  ;;  %v1954_v17 = vld [vmem:[%s2376_s3 + $0x324] ss:$8 sps:$4 sm:$0xff]   ;;  %v1952_v19 = vld [vmem:[%s2376_s3 + $0x320] ss:$8 sps:$4 sm:$0xff]   ;;  %v1960_v21 = vld [vmem:[%s2376_s3 + $0x334] ss:$8 sps:$4 sm:$0xff]  }
  0x77   : > { %1235 = vmatprep.subr.bf16.mxu0 %v1885_v29  ;;  %v1955_v22 = vld [vmem:[%s2376_s3 + $0x130] ss:$8 sps:$4 sm:$0xff]   ;;  %v1963_v24 = vld [vmem:[%s2376_s3 + $0x144] ss:$8 sps:$4 sm:$0xff]   ;;  %v1976_v48 = vld [vmem:[%s2376_s3 + $0x360] ss:$8 sps:$4 sm:$0xff]  }
  0x78   : > { %v1958_v23 = vld [vmem:[%s2376_s3 + $0x330] ss:$8 sps:$4 sm:$0xff]   ;;  %v1966_v25 = vld [vmem:[%s2376_s3 + $0x344] ss:$8 sps:$4 sm:$0xff]   ;;  %s2109_s23 = scalar_lea.vmem %s2533_s26, 320  ;;  %p2602_p11 = scmp.ne.s32.totalorder %s2593_s20, 0 }
  0x79   : > { %1114 = vmatpush1.bf16.msra.mxu1 %v1887_v30  ;;  %v211_v26 = vld [vmem:[#allocation2 + $0x40] sm:$0xff]  ;;  %v213_v28 = vld [vmem:[#allocation2 + $0x50] sm:$0xff]  ;;  %v2476_v52 = vld [vmem:[#allocation2 + $0x8] sm:$0xff]  ;;  %p2110_p9 = scmp.ne.s32.totalorder %s2533_s26, %s2109_s23  ;;  %s2204_s28 = smov [#allocation7]  }
  0x7a   : > { %1236 = vmatpush1.bf16.msra.mxu0 %v1888_v31  ;;  %1115 = vmatprep.subr.bf16.mxu1 %v1889_v32  ;;  %v215_v27 = vld [vmem:[#allocation2 + $0x60] sm:$0xff]  ;;  %v217_v30 = vld [vmem:[#allocation2 + $0x70] sm:$0xff]  ;;  %v2478_v53 = vld [vmem:[#allocation2 + $0x28] sm:$0xff]  ;;  %s2113_s4 = sshll.u32 %s2204_s28, 4  ;;  %s2114_s4 = int_to_ptr.vmem [resolvable:$false] %s2113_s4 }
  0x7b   : > { %1237 = vmatprep.subr.bf16.mxu0 %v1891_v33  ;;  %v1557_v29 = vcombine.high %v211_v26, %v215_v27  ;;  %v1561_v31 = vcombine.high %v213_v28, %v217_v30  ;;  %v1556_v32 = vcombine.low %v211_v26, %v215_v27  ;;  %v1961_v33 = vld [vmem:[%s2376_s3 + $0x140] ss:$8 sps:$4 sm:$0xff]   ;;  %v2480_v54 = vld [vmem:[#allocation2 + $0x18] sm:$0xff]  ;;  %p2111_p4 = pnand %p2110_p9, %p2602_p11  ;;  %s2115_s5 = scalar_lea.vmem %s2114_s4, 640 }
  0x7c   : > { %v2482_v55 = vld [vmem:[#allocation2 + $0x38] sm:$0xff]  ;;  %p2116_p0 = scmp.lt.s32.totalorder %s2533_s26, %s2114_s4  ;;  %p2117_p5 = scmp.lt.s32.totalorder %s2115_s5, %s2109_s23 }
  0x7d   : > { %1116 = vmatpush1.bf16.msra.mxu1 %v1893_v34  ;;  %v1964_v34 = vld [vmem:[%s2376_s3 + $0x340] ss:$8 sps:$4 sm:$0xff]   ;;  %v2031_v26 = vld [vmem:[%s2376_s3 + $0x1f0] ss:$8 sps:$4 sm:$0xff]   ;;  %p2112_p13 = pneg %p2111_p4 }
  0x7e   : > { %1238 = vmatpush1.bf16.msra.mxu0 %v1894_v35  ;;  %1117 = vmatprep.subr.bf16.mxu1 %v1895_v36  ;;  %v1560_v35 = vcombine.low %v213_v28, %v217_v30  ;;  %v1969_v36 = vld [vmem:[%s2376_s3 + $0x154] ss:$8 sps:$4 sm:$0xff]   ;;  %v2034_v27 = vld [vmem:[%s2376_s3 + $0x3f0] ss:$8 sps:$4 sm:$0xff]   ;;  %v212_v28 = vld [vmem:[#allocation2 + $0x48] sm:$0xff]  ;;  %p2118_p3 = por %p2117_p5, %p2116_p0 }
  0x7f   : > { %1239 = vmatprep.subr.bf16.mxu0 %v1897_v37  ;;  %v1972_v37 = vld [vmem:[%s2376_s3 + $0x354] ss:$8 sps:$4 sm:$0xff]  }
  0x80   : > { %v214_v30 = vld [vmem:[#allocation2 + $0x58] sm:$0xff]  ;;  %p2119_p6 = pnand %p2118_p3, %p2112_p13 }
  0x81   : > { %1118 = vmatpush1.bf16.msra.mxu1 %v1899_v38  ;;  %v219_v38 = vld [vmem:[#allocation2 + $0x80] sm:$0xff] }
  0x82   : > { %1240 = vmatpush1.bf16.msra.mxu0 %v1900_v39  ;;  %1119 = vmatprep.subr.bf16.mxu1 %v1901_v40  ;;  %v1565_v39 = vcombine.high %v219_v38, %v219_v38  ;;  %v221_v40 = vld [vmem:[#allocation2 + $0x90] sm:$0xff] }
  0x83   : > { %1241 = vmatprep.subr.bf16.mxu0 %v1903_v41  ;;  %v1967_v41 = vld [vmem:[%s2376_s3 + $0x150] ss:$8 sps:$4 sm:$0xff]   ;;  %v1568_v49 = vcombine.low %v221_v40, %v221_v40 }
  0x85   : > { %1120 = vmatpush1.bf16.msra.mxu1 %v1905_v42  ;;  %v1970_v42 = vld [vmem:[%s2376_s3 + $0x350] ss:$8 sps:$4 sm:$0xff]  }
  0x86   : > { %1242 = vmatpush1.bf16.msra.mxu0 %v1906_v43  ;;  %1121 = vmatprep.subr.bf16.mxu1 %v1907_v44  ;;  %v1569_v43 = vcombine.high %v221_v40, %v221_v40  ;;  %v1975_v44 = vld [vmem:[%s2376_s3 + $0x164] ss:$8 sps:$4 sm:$0xff]  }
  0x87   : > { %1243 = vmatprep.subr.bf16.mxu0 %v1909_v45  ;;  %v1978_v45 = vld [vmem:[%s2376_s3 + $0x364] ss:$8 sps:$4 sm:$0xff]  }
  0x89   : > { %1122 = vmatpush1.bf16.msra.mxu1 %v1911_v46  ;;  %v1973_v46 = vld [vmem:[%s2376_s3 + $0x160] ss:$8 sps:$4 sm:$0xff]  }
  0x8a   : > { %1244 = vmatpush1.bf16.msra.mxu0 %v1912_v47  ;;  %1123 = vmatprep.subr.bf16.mxu1 %v1913_v50  ;;  %v1564_v47 = vcombine.low %v219_v38, %v219_v38  ;;  %v1981_v50 = vld [vmem:[%s2376_s3 + $0x174] ss:$8 sps:$4 sm:$0xff]  }
  0x8b   : > { %1245 = vmatprep.subr.bf16.mxu0 %v1915_v51  ;;  %v1984_v51 = vld [vmem:[%s2376_s3 + $0x374] ss:$8 sps:$4 sm:$0xff]  }
  0x8d   : > { %1124 = vmatpush1.bf16.msra.mxu1 %v1917_v56  ;;  %v1551_v56 = vcombine.high %v2476_v52, %v2478_v53 }
  0x8e   : > { %1246 = vmatpush1.bf16.msra.mxu0 %v1918_v57  ;;  %1125 = vmatprep.subr.bf16.mxu1 %v1919_v58  ;;  %v1555_v57 = vcombine.high %v2480_v54, %v2482_v55  ;;  %v1979_v58 = vld [vmem:[%s2376_s3 + $0x170] ss:$8 sps:$4 sm:$0xff]  }
  0x8f   : > { %1247 = vmatprep.subr.bf16.mxu0 %v1921_v59  ;;  %v1982_v59 = vld [vmem:[%s2376_s3 + $0x370] ss:$8 sps:$4 sm:$0xff]  }
  0x91   : > { %1126 = vmatpush1.bf16.msra.mxu1 %v1923_v60  ;;  %v1987_v60 = vld [vmem:[%s2376_s3 + $0x184] ss:$8 sps:$4 sm:$0xff]  }
  0x92   : > { %1248 = vmatpush1.bf16.msra.mxu0 %v1924_v61  ;;  %1127 = vmatprep.subr.bf16.mxu1 %v1925_v62  ;;  %v1990_v61 = vld [vmem:[%s2376_s3 + $0x384] ss:$8 sps:$4 sm:$0xff]   ;;  %v1985_v62 = vld [vmem:[%s2376_s3 + $0x180] ss:$8 sps:$4 sm:$0xff]  }
  0x93   : > { %1249 = vmatprep.subr.bf16.mxu0 %v1927_v63  ;;  %v1988_v63 = vld [vmem:[%s2376_s3 + $0x380] ss:$8 sps:$4 sm:$0xff]  }
  0x95   : > { %1128 = vmatpush1.bf16.msra.mxu1 %v1929_v0  ;;  %v1993_v0 = vld [vmem:[%s2376_s3 + $0x194] ss:$8 sps:$4 sm:$0xff]  }
  0x96   : > { %1250 = vmatpush1.bf16.msra.mxu0 %v1930_v1  ;;  %1129 = vmatprep.subr.bf16.mxu1 %v1931_v2  ;;  %v1996_v1 = vld [vmem:[%s2376_s3 + $0x394] ss:$8 sps:$4 sm:$0xff]   ;;  %v1991_v2 = vld [vmem:[%s2376_s3 + $0x190] ss:$8 sps:$4 sm:$0xff]  }
  0x97   : > { %1251 = vmatprep.subr.bf16.mxu0 %v1933_v3  ;;  %v1994_v3 = vld [vmem:[%s2376_s3 + $0x390] ss:$8 sps:$4 sm:$0xff]  }
  0x99   : > { %1130 = vmatpush1.bf16.msra.mxu1 %v1935_v4  ;;  %v1999_v4 = vld [vmem:[%s2376_s3 + $0x1a4] ss:$8 sps:$4 sm:$0xff]  }
  0x9a   : > { %1252 = vmatpush1.bf16.msra.mxu0 %v1936_v5  ;;  %1160 = vmatprep.subr.bf16.mxu1 %v1939_v6  ;;  %v2002_v5 = vld [vmem:[%s2376_s3 + $0x3a4] ss:$8 sps:$4 sm:$0xff]   ;;  %v1997_v6 = vld [vmem:[%s2376_s3 + $0x1a0] ss:$8 sps:$4 sm:$0xff]  }
  0x9b   : > { %1282 = vmatprep.subr.bf16.mxu0 %v1942_v7  ;;  %v2000_v7 = vld [vmem:[%s2376_s3 + $0x3a0] ss:$8 sps:$4 sm:$0xff]  }
  0x9c   : > { %1132 = vmatmul.mubr.bf16.vlgmr.msra.gmra.mrb[0].mxu1 %v1548_v8  ;;  %v2005_v8 = vld [vmem:[%s2376_s3 + $0x1b4] ss:$8 sps:$4 sm:$0xff]  }
  0x9d   : > { %1254 = vmatmul.mubr.bf16.vlgmr.msra.gmra.mrb[0].mxu0 %v1552_v10  ;;  %1161 = vmatpush1.bf16.msra.mxu1 %v1937_v9  ;;  %v2008_v9 = vld [vmem:[%s2376_s3 + $0x3b4] ss:$8 sps:$4 sm:$0xff]   ;;  %v2003_v10 = vld [vmem:[%s2376_s3 + $0x1b0] ss:$8 sps:$4 sm:$0xff]  }
  0x9e   : > { %1283 = vmatpush1.bf16.msra.mxu0 %v1940_v11  ;;  %1162 = vmatprep.subr.bf16.mxu1 %v1945_v12  ;;  %v2006_v11 = vld [vmem:[%s2376_s3 + $0x3b0] ss:$8 sps:$4 sm:$0xff]   ;;  %v2011_v12 = vld [vmem:[%s2376_s3 + $0x1c4] ss:$8 sps:$4 sm:$0xff]  }
  0x9f   : > { %1284 = vmatprep.subr.bf16.mxu0 %v1948_v13  ;;  %1141 = vmatprep.mubr.bf16.mxu1 %v1557_v29  ;;  %v2014_v13 = vld [vmem:[%s2376_s3 + $0x3c4] ss:$8 sps:$4 sm:$0xff]  }
  0xa0   : > { %1263 = vmatprep.mubr.bf16.mxu0 %v1561_v31  ;;  %v216_v29 = vld [vmem:[#allocation2 + $0x68] sm:$0xff]  ;;  %v218_v31 = vld [vmem:[#allocation2 + $0x78] sm:$0xff] }
  0xa1   : > { %1163 = vmatpush1.bf16.msra.mxu1 %v1943_v14  ;;  %v2009_v14 = vld [vmem:[%s2376_s3 + $0x1c0] ss:$8 sps:$4 sm:$0xff]   ;;  %v1558_v38 = vcombine.low %v212_v28, %v216_v29 }
  0xa2   : > { %1285 = vmatpush1.bf16.msra.mxu0 %v1946_v15  ;;  %1164 = vmatprep.subr.bf16.mxu1 %v1951_v16  ;;  %v2012_v15 = vld [vmem:[%s2376_s3 + $0x3c0] ss:$8 sps:$4 sm:$0xff]   ;;  %v2017_v16 = vld [vmem:[%s2376_s3 + $0x1d4] ss:$8 sps:$4 sm:$0xff]  }
  0xa3   : > { %1286 = vmatprep.subr.bf16.mxu0 %v1954_v17  ;;  %v2020_v17 = vld [vmem:[%s2376_s3 + $0x3d4] ss:$8 sps:$4 sm:$0xff]  }
  0xa4   : > { %1142 = vmatmul.mubr.bf16.gmra.mrb[4].mxu1 %v1556_v32  ;;  %v1550_v32 = vcombine.low %v2476_v52, %v2478_v53 }
  0xa5   : > { %1165 = vmatpush1.bf16.msra.mxu1 %v1949_v18  ;;  %1264 = vmatmul.mubr.bf16.gmra.mrb[4].mxu0 %v1560_v35  ;;  %v2015_v18 = vld [vmem:[%s2376_s3 + $0x1d0] ss:$8 sps:$4 sm:$0xff]   ;;  %v1563_v35 = vcombine.high %v214_v30, %v218_v31 }
  0xa6   : > { %1287 = vmatpush1.bf16.msra.mxu0 %v1952_v19  ;;  %1166 = vmatprep.subr.bf16.mxu1 %v1957_v20  ;;  %v2018_v19 = vld [vmem:[%s2376_s3 + $0x3d0] ss:$8 sps:$4 sm:$0xff]   ;;  %v2026_v20 = vld [vmem:[%s2376_s3 + $0x1e4] ss:$8 sps:$4 sm:$0xff]  }
  0xa7   : > { %1288 = vmatprep.subr.bf16.mxu0 %v1960_v21  ;;  %1151 = vmatprep.mubr.bf16.mxu1 %v1565_v39  ;;  %v2030_v21 = vld [vmem:[%s2376_s3 + $0x3e4] ss:$8 sps:$4 sm:$0xff]   ;;  %v1562_v39 = vcombine.low %v214_v30, %v218_v31 }
  0xa8   : > { %1273 = vmatprep.mubr.bf16.mxu0 %v1569_v43 }
  0xa9   : > { %1167 = vmatpush1.bf16.msra.mxu1 %v1955_v22  ;;  %v2024_v22 = vld [vmem:[%s2376_s3 + $0x1e0] ss:$8 sps:$4 sm:$0xff]  }
  0xaa   : > { %1289 = vmatpush1.bf16.msra.mxu0 %v1958_v23  ;;  %1168 = vmatprep.subr.bf16.mxu1 %v1963_v24  ;;  %v2028_v23 = vld [vmem:[%s2376_s3 + $0x3e0] ss:$8 sps:$4 sm:$0xff]   ;;  %v2033_v24 = vld [vmem:[%s2376_s3 + $0x1f4] ss:$8 sps:$4 sm:$0xff]  }
  0xab   : > { %1290 = vmatprep.subr.bf16.mxu0 %v1966_v25  ;;  %v2036_v25 = vld [vmem:[%s2376_s3 + $0x3f4] ss:$8 sps:$4 sm:$0xff]  }
  0xac   : > { %1152 = vmatmul.mubr.bf16.gmra.mrb[8].mxu1 %v1564_v47 }
  0xad   : > { %1169 = vmatpush1.bf16.msra.mxu1 %v1961_v33  ;;  %1274 = vmatmul.mubr.bf16.gmra.mrb[8].mxu0 %v1568_v49  ;;  %v1554_v33 = vcombine.low %v2480_v54, %v2482_v55 }
  0xae   : > { %1291 = vmatpush1.bf16.msra.mxu0 %v1964_v34  ;;  %1170 = vmatprep.subr.bf16.mxu1 %v1969_v36  ;;  %v1559_v34 = vcombine.high %v212_v28, %v216_v29  ;;  %v220_v36 = vld [vmem:[#allocation2 + $0x88] sm:$0xff] }
  0xaf   : > { %1292 = vmatprep.subr.bf16.mxu0 %v1972_v37  ;;  %1192 = vmatprep.mubr.bf16.mxu1 %v1551_v56  ;;  %v222_v37 = vld [vmem:[#allocation2 + $0x98] sm:$0xff]  ;;  %v1567_v40 = vcombine.high %v220_v36, %v220_v36 }
  0xb0   : > { %1314 = vmatprep.mubr.bf16.mxu0 %v1555_v57  ;;  %v1570_v43 = vcombine.low %v222_v37, %v222_v37 }
  0xb1   : > { %1171 = vmatpush1.bf16.msra.mxu1 %v1967_v41  ;;  %v1571_v41 = vcombine.high %v222_v37, %v222_v37 }
  0xb2   : > { %1293 = vmatpush1.bf16.msra.mxu0 %v1970_v42  ;;  %1172 = vmatprep.subr.bf16.mxu1 %v1975_v44  ;;  %v1566_v42 = vcombine.low %v220_v36, %v220_v36 }
  0xb3   : > { %1294 = vmatprep.subr.bf16.mxu0 %v1978_v45 }
  0xb5   : > { %1173 = vmatpush1.bf16.msra.mxu1 %v1973_v46 }
  0xb6   : > { %1295 = vmatpush1.bf16.msra.mxu0 %v1976_v48  ;;  %1174 = vmatprep.subr.bf16.mxu1 %v1981_v50 }
  0xb7   : > { %1296 = vmatprep.subr.bf16.mxu0 %v1984_v51 }
  0xb9   : > { %1175 = vmatpush1.bf16.msra.mxu1 %v1979_v58 }
  0xba   : > { %1297 = vmatpush1.bf16.msra.mxu0 %v1982_v59  ;;  %1176 = vmatprep.subr.bf16.mxu1 %v1987_v60 }
  0xbb   : > { %1298 = vmatprep.subr.bf16.mxu0 %v1990_v61 }
  0xbd   : > { %1177 = vmatpush1.bf16.msra.mxu1 %v1985_v62 }
  0xbe   : > { %1299 = vmatpush1.bf16.msra.mxu0 %v1988_v63  ;;  %1178 = vmatprep.subr.bf16.mxu1 %v1993_v0 }
  0xbf   : > { %1300 = vmatprep.subr.bf16.mxu0 %v1996_v1 }
  0xc1   : > { %1179 = vmatpush1.bf16.msra.mxu1 %v1991_v2 }
  0xc2   : > { %1301 = vmatpush1.bf16.msra.mxu0 %v1994_v3  ;;  %1180 = vmatprep.subr.bf16.mxu1 %v1999_v4 }
  0xc3   : > { %1302 = vmatprep.subr.bf16.mxu0 %v2002_v5 }
  0xc5   : > { %1181 = vmatpush1.bf16.msra.mxu1 %v1997_v6 }
  0xc6   : > { %1303 = vmatpush1.bf16.msra.mxu0 %v2000_v7  ;;  %1182 = vmatprep.subr.bf16.mxu1 %v2005_v8 }
  0xc7   : > { %1304 = vmatprep.subr.bf16.mxu0 %v2008_v9 }
  0xc9   : > { %1183 = vmatpush1.bf16.msra.mxu1 %v2003_v10 }
  0xca   : > { %1305 = vmatpush1.bf16.msra.mxu0 %v2006_v11  ;;  %1184 = vmatprep.subr.bf16.mxu1 %v2011_v12 }
  0xcb   : > { %1306 = vmatprep.subr.bf16.mxu0 %v2014_v13 }
  0xcd   : > { %1185 = vmatpush1.bf16.msra.mxu1 %v2009_v14 }
  0xce   : > { %1307 = vmatpush1.bf16.msra.mxu0 %v2012_v15  ;;  %1186 = vmatprep.subr.bf16.mxu1 %v2017_v16 }
  0xcf   : > { %1308 = vmatprep.subr.bf16.mxu0 %v2020_v17 }
  0xd1   : > { %1187 = vmatpush1.bf16.msra.mxu1 %v2015_v18 }
  0xd2   : > { %1309 = vmatpush1.bf16.msra.mxu0 %v2018_v19  ;;  %1188 = vmatprep.subr.bf16.mxu1 %v2026_v20 }
  0xd3   : > { %1310 = vmatprep.subr.bf16.mxu0 %v2030_v21 }
  0xd5   : > { %1189 = vmatpush1.bf16.msra.mxu1 %v2024_v22 }
  0xd6   : > { %1311 = vmatpush1.bf16.msra.mxu0 %v2028_v23  ;;  %1190 = vmatprep.subr.bf16.mxu1 %v2033_v24 }
  0xd7   : > { %1312 = vmatprep.subr.bf16.mxu0 %v2036_v25 }
  0xd9   : > { %1191 = vmatpush1.bf16.msra.mxu1 %v2031_v26 }
  0xda   : > { %1313 = vmatpush1.bf16.msra.mxu0 %v2034_v27 }
  0xdc   : > { %1193 = vmatmul.mubr.bf16.vlgmr.msra.gmra.mrb[0].mxu1 %v1550_v32 }
  0xdd   : > { %1315 = vmatmul.mubr.bf16.vlgmr.msra.gmra.mrb[0].mxu0 %v1554_v33  ;;  %1202 = vmatprep.mubr.bf16.mxu1 %v1559_v34 }
  0xde   : > { %1324 = vmatprep.mubr.bf16.mxu0 %v1563_v35 }
  0xe4   : > { %1203 = vmatmul.mubr.bf16.gmra.mrb[4].mxu1 %v1558_v38 }
  0xe5   : > { %1325 = vmatmul.mubr.bf16.gmra.mrb[4].mxu0 %v1562_v39  ;;  %1212 = vmatprep.mubr.bf16.mxu1 %v1567_v40 }
  0xe6   : > { %1334 = vmatprep.mubr.bf16.mxu0 %v1571_v41 }
  0xec   : > { %1213 = vmatmul.mubr.bf16.gmra.mrb[8].mxu1 %v1566_v42 }
  0xed   : > { %1335 = vmatmul.mubr.bf16.gmra.mrb[8].mxu0 %v1570_v43 }
 0x1af   : > { %v1194_v44 = vpop.f32.mrb[0].mxu1 }
 0x1b0   : > { %v1316_v45 = vpop.f32.mrb[0].mxu0  ;;  %v1196_v47 = vpop.f32.mrb[1].mxu1 }
 0x1b1   : > { %v1725_v46 = vadd.f32 %v1316_v45, %v1194_v44  ;;  %v1318_v48 = vpop.f32.mrb[1].mxu0  ;;  %v1198_v50 = vpop.f32.mrb[2].mxu1 }
 0x1b2   : > { %v1726_v49 = vadd.f32 %v1318_v48, %v1196_v47  ;;  %v1320_v51 = vpop.f32.mrb[2].mxu0  ;;  %v1200_v54 = vpop.f32.mrb[3].mxu1 }
 0x1b3   : > { %v1343_v52 = vmul.f32 %v1725_v46, %v1725_v46  ;;  %v1727_v53 = vadd.f32 %v1320_v51, %v1198_v50  ;;  %v1322_v55 = vpop.f32.mrb[3].mxu0 }
 0x1b4   : > { %v1348_v56 = vmul.f32 %v1726_v49, %v1726_v49  ;;  %v1728_v57 = vadd.f32 %v1322_v55, %v1200_v54 }
 0x1b5   : > { %v1344_v58 = vmul.f32 %v1727_v53, %v1727_v53 }
 0x1b6   : > { %v1353_v59 = vadd.f32 %v1348_v56, %v1343_v52  ;;  %v1349_v60 = vmul.f32 %v1728_v57, %v1728_v57 }
 0x1b7   : > { %v1204_v63 = vpop.f32.mrb[4].mxu1 }
 0x1b8   : > { %v1358_v61 = vmax.f32 %v1353_v59, 1e-07  ;;  %v1354_v62 = vadd.f32 %v1349_v60, %v1344_v58  ;;  %v1326_v0 = vpop.f32.mrb[4].mxu0  ;;  %v1206_v2 = vpop.f32.mrb[5].mxu1 }
 0x1b9   : > { %v1729_v1 = vadd.f32 %v1326_v0, %v1204_v63  ;;  %v1328_v3 = vpop.f32.mrb[5].mxu0  ;;  %v1208_v4 = vpop.f32.mrb[6].mxu1 }
 0x1ba   : > { %2041 = vrsqrt.f32 %v1358_v61  ;;  %v1330_v5 = vpop.f32.mrb[6].mxu0  ;;  %v1359_v6 = vmax.f32 %v1354_v62, 1e-07  ;;  %v1730_v7 = vadd.f32 %v1328_v3, %v1206_v2  ;;  %v1210_v9 = vpop.f32.mrb[7].mxu1  ;;  %vm1365_vm0 = vcmp.eq.f32.partialorder %v1358_v61, inf }
 0x1bb   : > { %v1731_v8 = vadd.f32 %v1330_v5, %v1208_v4  ;;  %v1332_v10 = vpop.f32.mrb[7].mxu0  ;;  %v1345_v11 = vmul.f32 %v1729_v1, %v1729_v1  ;;  %v1368_v38 = vand.u32 2147483648, %v1358_v61  ;;  %vm1367_vm2 = vcmp.eq.f32.partialorder %v1358_v61, 0.0 }
 0x1bc   : > { %v1732_v12 = vadd.f32 %v1332_v10, %v1210_v9  ;;  %2043 = vrsqrt.f32 %v1359_v6  ;;  %v1350_v13 = vmul.f32 %v1730_v7, %v1730_v7  ;;  %vm1372_vm1 = vcmp.eq.f32.partialorder %v1359_v6, inf }
 0x1bd   : > { %v1346_v14 = vmul.f32 %v1731_v8, %v1731_v8  ;;  %v1375_v39 = vand.u32 2147483648, %v1359_v6  ;;  %vm1374_vm3 = vcmp.eq.f32.partialorder %v1359_v6, 0.0 }
 0x1be   : > { %v1351_v15 = vmul.f32 %v1732_v12, %v1732_v12  ;;  %v1355_v16 = vadd.f32 %v1350_v13, %v1345_v11 }
 0x1bf   : > { %v1214_v18 = vpop.f32.mrb[8].mxu1 }
 0x1c0   : > { %v1356_v17 = vadd.f32 %v1351_v15, %v1346_v14  ;;  %v1336_v19 = vpop.f32.mrb[8].mxu0  ;;  %v1216_v21 = vpop.f32.mrb[9].mxu1  ;;  %v1360_v23 = vmax.f32 %v1355_v16, 1e-07 }
 0x1c1   : > { %v1733_v20 = vadd.f32 %v1336_v19, %v1214_v18  ;;  %v1338_v22 = vpop.f32.mrb[9].mxu0  ;;  %v1218_v26 = vpop.f32.mrb[10].mxu1 }
 0x1c2   : > { %v1361_v24 = vmax.f32 %v1356_v17, 1e-07  ;;  %v1734_v25 = vadd.f32 %v1338_v22, %v1216_v21  ;;  %v1340_v27 = vpop.f32.mrb[10].mxu0  ;;  %v1219_v28 = vpop.f32.mrb[11].mxu1  ;;  %2045 = vrsqrt.f32 %v1360_v23  ;;  %vm1379_vm4 = vcmp.eq.f32.partialorder %v1360_v23, inf }
 0x1c3   : > { %v1341_v29 = vpop.f32.mrb[11].mxu0  ;;  %v1347_v31 = vmul.f32 %v1733_v20, %v1733_v20  ;;  %v1382_v50 = vand.u32 2147483648, %v1360_v23  ;;  %vm1381_vm6 = vcmp.eq.f32.partialorder %v1360_v23, 0.0 }
 0x1c4   : > { %v2042_v30 = vpop.eup %2041  ;;  %2047 = vrsqrt.f32 %v1361_v24  ;;  %v1352_v33 = vmul.f32 %v1734_v25, %v1734_v25  ;;  %vm1386_vm5 = vcmp.eq.f32.partialorder %v1361_v24, inf  ;;  %v1389_v51 = vand.u32 2147483648, %v1361_v24 }
 0x1c5   : > { %v1364_v32 = vmul.f32 %v2042_v30, %v1358_v61  ;;  %vm1388_vm7 = vcmp.eq.f32.partialorder %v1361_v24, 0.0 }
 0x1c6   : > { %v2044_v34 = vpop.eup %2043  ;;  %v1357_v37 = vadd.f32 %v1352_v33, %v1347_v31 }
 0x1c7   : > { %v1366_v35 = vsel %vm1365_vm0, %v1358_v61, %v1364_v32  ;;  %v1371_v36 = vmul.f32 %v2044_v34, %v1359_v6 }
 0x1c8   : > { %v1362_v41 = vmax.f32 %v1357_v37, 1e-07  ;;  %v1369_v42 = vsel %vm1367_vm2, %v1368_v38, %v1366_v35 }
 0x1c9   : > { %v1373_v40 = vsel %vm1372_vm1, %v1359_v6, %v1371_v36 }
 0x1ca   : > { %v1376_v43 = vsel %vm1374_vm3, %v1375_v39, %v1373_v40  ;;  %2049 = vrsqrt.f32 %v1362_v41  ;;  %vm1393_vm8 = vcmp.eq.f32.partialorder %v1362_v41, inf  ;;  %v1396_v58 = vand.u32 2147483648, %v1362_v41 }
 0x1cb   : > { %v1717_v44 = vpack.c.bf16 %v1376_v43, %v1369_v42  ;;  %vm1395_vm9 = vcmp.eq.f32.partialorder %v1362_v41, 0.0 }
 0x1cc   : > { %v2046_v45 = vpop.eup %2045 }
 0x1cd   : > { %1718 = vst [vmem:[%s199_s19] sm:$0xff] %v1717_v44   ;;  %v1378_v47 = vmul.f32 %v2046_v45, %v1360_v23 }
 0x1ce   : > { %v2048_v46 = vpop.eup %2047 }
 0x1cf   : > { %v1385_v48 = vmul.f32 %v2048_v46, %v1361_v24  ;;  %v1380_v49 = vsel %vm1379_vm4, %v1360_v23, %v1378_v47 }
 0x1d0   : > { %v1383_v53 = vsel %vm1381_vm6, %v1382_v50, %v1380_v49 }
 0x1d1   : > { %v1387_v52 = vsel %vm1386_vm5, %v1361_v24, %v1385_v48 }
 0x1d2   : > { %v1390_v54 = vsel %vm1388_vm7, %v1389_v51, %v1387_v52 }
 0x1d3   : > { %v1722_v55 = vpack.c.bf16 %v1390_v54, %v1383_v53 }
 0x1d4   : > { %v2050_v56 = vpop.eup %2049 }
 0x1d5   : > { %1724 = vst [vmem:[%s199_s19 + $0x8] sm:$0xff] %v1722_v55   ;;  %v1392_v57 = vmul.f32 %v2050_v56, %v1362_v41 }
 0x1d7   : > { %v1394_v59 = vsel %vm1393_vm8, %v1362_v41, %v1392_v57 }
 0x1d8   : > { %v1397_v60 = vsel %vm1395_vm9, %v1396_v58, %v1394_v59 }
 0x1d9   : > { %v1713_v61 = vpack.c.bf16 %v1397_v60, %v1397_v60 }
 0x1db   : > { %1423 = vst [vmem:[%s199_s19 + $0x10] sm:$0xf] %v1713_v61 }
 0x1dc   : > { %2122 = shalt.err (!%p2119_p6)
}
 0x1dd   : > { %s2123_s24 = scalar_lea.hbm %s2531_s8, 320  ;;  %s2127_s30 = scalar_lea.hbm %s2583_s2, 1600 }
 0x1de   : > { %p2124_p12 = scmp.ne.s32.totalorder %s2531_s8, %s2123_s24  ;;  %p2128_p10 = scmp.lt.u32.totalorder %s2531_s8, %s2583_s2 }
 0x1df   : > { %p2129_p1 = scmp.lt.u32.totalorder %s2127_s30, %s2123_s24  ;;  %p2131_p9 = scmp.lt.u32.totalorder %s2123_s24, %s2531_s8 }
 0x1e0   : > { %p2125_p2 = pnand %p2124_p12, %p2602_p11 }
 0x1e1   : > { %p2130_p8 = por %p2129_p1, %p2128_p10 }
 0x1e2   : > { %p2126_p7 = pneg %p2125_p2 }
 0x1e3   : > { %p2132_p4 = por %p2131_p9, %p2130_p8 }
 0x1e5   : > { %p2133_p13 = pnand %p2132_p4, %p2126_p7 }
 0x1e7   : > { %2136 = shalt.err (!%p2133_p13)
}
 0x1e8   : > { %s2205_s17 = smov 64   ;;  %s2206_s19 = smov 320  }
 0x1e9   : > { %s2207_s22 = smov 4  }
 0x1ea   : > { %1766 = dma.vmem_to_hbm [thread:$0]  (%p2602_p11), %s2533_s26, 320, %s2531_s8, %s1425_s12, %s2205_s17, %s2206_s19, %s2207_s22  }
 0x1eb PF: > { %p1783_p0 = scmp.ge.s32.totalorder %s2195_s14, 2  ;;  %s1455_s25 = sand.u32 1, %s2175_s9  }
 0x1ec   : > { %p2603_p5 = scmp.ne.s32.totalorder %s2594_s21, 0  ;;  %s1456_s6 = scalar_lea.sflag [#allocation4], %s1455_s25 }
 0x1ee   : > { %p1777_p3 = pnand %p1783_p0, %p2603_p5 }
 0x1f0   : > { %2170 = dma.done.wait (!%p1777_p3), %s1456_s6, 320  }
 0x1f1   : > { %2172 = vsyncadd (!%p1777_p3), %s1456_s6, 4294966976  ;;  %s19_s14 = sadd.s32 1, %s2195_s14   ;;  %s2604_s9 = smov %s2179_s10 }
 0x1f2   : > { %p16_p6 = scmp.ge.s32.totalorder %s19_s14, 7   ;;  %s2605_s10 = smov %s2183_s11 }
 0x1f3   : > { %s2606_s11 = smov %s2333_s7  ;;  %s2607_s12 = smov %s2191_s13 }
 0x1f4   : > { %s2608_s13 = smov %s2610_s27  ;;  %18 = sbr.rel (!%p16_p6) target bundleno = 7 (0x7), region = 79 }
 0x1fb   :  { %1461 = vsyncpa [#allocation3], 1 }
 0x1fc   :  { %1463 = vsyncpa [#allocation3 + $0x1], 1 }
 0x1fd   :  { %1464 = vsyncpa [#allocation6], 1 }
 0x1fe   :  { %1466 = vsyncpa [#allocation6 + $0x1], 1 }
 0x1ff   :  { %1467 = vsyncpa [#allocation4], 1 }
 0x200   :  { %1469 = vsyncpa [#allocation4 + $0x1], 1 }

</bundles_post_ra>
